<compile_context>
chip_gen: v7x
topology: tpu7x:2x2x1
jax: 0.10.0
libtpu: 0.0.40
codegen_flags: <defaults>
</compile_context>

<pallas_src>
import numpy as np
import jax
import jax.numpy as jnp
from jax.experimental import pallas as pl
from jax.experimental.pallas import tpu as pltpu


# ----------------------------------------------------------------------------
# Morlet wavelet bank (kymatio-style filter construction, spatial domain)
# ----------------------------------------------------------------------------
def _gabor_2d(M, N, sigma, theta, xi, slant=1.0):
    gab = np.zeros((M, N), dtype=np.complex128)
    R = np.array([[np.cos(theta), -np.sin(theta)],
                  [np.sin(theta),  np.cos(theta)]])
    R_inv = np.array([[np.cos(theta),  np.sin(theta)],
                      [-np.sin(theta), np.cos(theta)]])
    D = np.array([[1.0, 0.0], [0.0, slant * slant]])
    curv = R @ D @ R_inv / (2.0 * sigma * sigma)
    for ex in (-2, -1, 0, 1):
        for ey in (-2, -1, 0, 1):
            xx, yy = np.mgrid[ex * M: M + ex * M, ey * N: N + ey * N]
            arg = (-(curv[0, 0] * xx * xx
                     + (curv[0, 1] + curv[1, 0]) * xx * yy
                     + curv[1, 1] * yy * yy)
                   + 1j * (xx * xi * np.cos(theta) + yy * xi * np.sin(theta)))
            gab = gab + np.exp(arg)
    gab = gab / (2.0 * np.pi * sigma * sigma / slant)
    return gab


def _morlet_2d(M, N, sigma, theta, xi, slant):
    wv = _gabor_2d(M, N, sigma, theta, xi, slant)
    wv_mod = _gabor_2d(M, N, sigma, theta, 0.0, slant)
    K = np.sum(wv) / np.sum(wv_mod)
    return wv - K * wv_mod


def _bilinear_1d(out_size, in_size):
    """(in_size, out_size) matrix for PyTorch bilinear (align_corners=False)."""
    U = np.zeros((in_size, out_size), np.float64)
    scale = in_size / out_size
    for i in range(out_size):
        src = (i + 0.5) * scale - 0.5
        src = max(src, 0.0)
        i0 = min(int(np.floor(src)), in_size - 1)
        i1 = min(i0 + 1, in_size - 1)
        lam = src - i0
        U[i0, i] += 1.0 - lam
        U[i1, i] += lam
    return U


def build_operators(S, L=8):
    """Precompute the linear operators of the forward pass as bf16 matrices.

    psi_all is laid out per orientation: columns [t*2*HW : (t+1)*2*HW] are
    [Re psi_t | Im psi_t], so a single (HW, 2*HW) column tile is one grid step.
    """
    H = W = S
    H2, W2 = H // 2, W // 2

    # --- Morlet wavelets at j=0 (kymatio J=1, L=8 parameters) ---
    slant = 4.0 / L
    psi_spatial = []
    for t in range(L):
        theta = (int(L - L / 2 - 1) - t) * np.pi / L
        psi_spatial.append(_morlet_2d(H, W, 0.8, theta, 3.0 * np.pi / 4.0, slant))
    phi_spatial = np.real(_gabor_2d(H, W, 0.8 * 2 ** (1 - 1), 0.0, 0.0, 1.0))

    c = np.arange(H)[:, None, None, None]
    d = np.arange(W)[None, :, None, None]
    a = np.arange(H)[None, None, :, None]
    b = np.arange(W)[None, None, None, :]

    # circulant matrices for periodic wavelet convolution, one [Re|Im] pair
    # of column blocks per orientation
    psi_blocks = []
    for t in range(L):
        circ = psi_spatial[t][(a - c) % H, (b - d) % W].reshape(H * W, H * W)
        psi_blocks.append(np.real(circ))
        psi_blocks.append(np.imag(circ))
    psi_all = np.concatenate(psi_blocks, axis=1).astype(np.float32)   # (HW, 2*L*HW)

    # low-pass phi + stride-2 subsample fused into one (HW_in, H2*W2) matrix
    a2 = np.arange(H2)[None, None, :, None]
    b2 = np.arange(W2)[None, None, None, :]
    phi_ds = phi_spatial[(2 * a2 - c) % H, (2 * b2 - d) % W]
    phi_ds = phi_ds.reshape(H * W, H2 * W2).astype(np.float32)

    # bilinear 2x upsample (align_corners=False): (H2*W2, HW_out)
    u_h = _bilinear_1d(H, H2)
    u_w = _bilinear_1d(W, W2)
    up = (u_h[:, None, :, None] * u_w[None, :, None, :]).reshape(H2 * W2, H * W)
    up = up.astype(np.float32)

    # bf16 filters: half the HBM/VMEM bytes, native MXU dtype on v5e/v6e/v7x.
    return (jnp.asarray(psi_all, dtype=jnp.bfloat16),
            jnp.asarray(phi_ds, dtype=jnp.bfloat16),
            jnp.asarray(up, dtype=jnp.bfloat16))


def build_conv_params(w1x1, bias, N):
    """Batch-folded block-diagonal 1x1-conv weight (bf16) + tiled bias (f32).

    Built once outside the per-call path (review item: no per-call kron/tile).
    """
    Co = w1x1.shape[0]
    w_blk = jnp.kron(jnp.eye(N, dtype=jnp.float32),
                     w1x1.astype(jnp.float32)).astype(jnp.bfloat16)   # (N*Co, N*C)
    b_blk = jnp.tile(bias.reshape(Co, 1).astype(jnp.float32), (N, 1))  # (N*Co, 1)
    return w_blk, b_blk


def _choose_m_split(N, C, Co):
    """Split the batch rows into grid blocks (shards across v7x's two
    TensorCores) only when the per-block shapes stay (8,128)-BlockSpec-legal."""
    for mb in (2,):
        if N % mb == 0:
            nb = N // mb
            if (nb * C) % 128 == 0 and (nb * Co) % 8 == 0:
                return mb
    return 1


# ----------------------------------------------------------------------------
# Pallas kernel: per-orientation fused modulus / low-pass / running max,
# then (at the last orientation) bilinear upsample + block-diagonal 1x1 conv.
# ----------------------------------------------------------------------------
def _scatter_kernel(x_ref, psi_ref, phi_ref, up_ref, w_ref, b_ref, o_ref,
                    smax_ref):
    t = pl.program_id(1)
    hw = psi_ref.shape[1] // 2          # psi block is [Re psi_t | Im psi_t]

    # one orientation: (tm, HW) @ (HW, 2*HW) -> (tm, 2*HW); lane slices are
    # 128-aligned, no relayout.
    xb = x_ref[...].astype(jnp.bfloat16)
    u = jnp.dot(xb, psi_ref[...], preferred_element_type=jnp.float32)
    ur = u[:, :hw]
    ui = u[:, hw:]
    mod = jnp.sqrt(ur * ur + ui * ui)                       # |x (*) psi_t|, f32

    # low-pass + stride-2 subsample for this orientation: (tm, H2*W2)
    s_t = jnp.dot(mod.astype(jnp.bfloat16), phi_ref[...],
                  preferred_element_type=jnp.float32)

    # running max over orientations in a small f32 VMEM scratch
    @pl.when(t == 0)
    def _():
        smax_ref[...] = s_t

    @pl.when(t != 0)
    def _():
        smax_ref[...] = jnp.maximum(smax_ref[...], s_t)

    # finalize: bilinear 2x upsample + block-diagonal 1x1 conv (+ bias)
    @pl.when(t == pl.num_programs(1) - 1)
    def _():
        y = jnp.dot(smax_ref[...].astype(jnp.bfloat16), up_ref[...],
                    preferred_element_type=jnp.float32)      # (tm, HW)
        out = jnp.dot(w_ref[...], y.astype(jnp.bfloat16),
                      preferred_element_type=jnp.float32) + b_ref[...]
        o_ref[...] = out.astype(o_ref.dtype)                 # (to, HW)


def scatter_transform_max(x, psi_all, phi_ds, up, w_blk, b_blk):
    """x: (N, C, H, W) NCHW float32 -> (N, C_out, H, W)."""
    N, C, H, W = x.shape
    HW = H * W
    H2W2 = (H // 2) * (W // 2)
    NCo = w_blk.shape[0]
    Co = NCo // N
    L = psi_all.shape[1] // (2 * HW)
    M = N * C

    mb = _choose_m_split(N, C, Co)      # parallel batch-row blocks (v7x 2nd TC)
    nb = N // mb                        # batches per block
    tm = nb * C                         # x / y rows per block
    to = nb * Co                        # output rows per block

    x2 = x.reshape(M, HW)

    flops = (2 * M * HW * (2 * L * HW)          # wavelet bank (L column tiles)
             + 2 * L * M * HW * H2W2            # low-pass + /2 subsample
             + 2 * M * H2W2 * HW                # bilinear upsample
             + 2 * mb * to * tm * HW)           # block-diagonal 1x1 conv
    bytes_accessed = int(x2.size * 4 + psi_all.size * 2 + phi_ds.size * 2
                         + up.size * 2 + w_blk.size * 2 + b_blk.size * 4
                         + NCo * HW * 4)

    out = pl.pallas_call(
        _scatter_kernel,
        out_shape=jax.ShapeDtypeStruct((NCo, HW), x.dtype),
        grid_spec=pltpu.PrefetchScalarGridSpec(
            num_scalar_prefetch=0,
            grid=(mb, L),                                   # (batch rows, orientations)
            in_specs=[
                pl.BlockSpec((tm, HW), lambda i, t: (i, 0)),        # x rows
                pl.BlockSpec((HW, 2 * HW), lambda i, t: (0, t)),    # [Re|Im] psi_t tile
                pl.BlockSpec(phi_ds.shape, lambda i, t: (0, 0)),    # low-pass + down
                pl.BlockSpec(up.shape, lambda i, t: (0, 0)),        # bilinear upsample
                pl.BlockSpec((to, tm), lambda i, t: (i, i)),        # block-diag 1x1 weight
                pl.BlockSpec((to, 1), lambda i, t: (i, 0)),         # bias
            ],
            out_specs=pl.BlockSpec((to, HW), lambda i, t: (i, 0)),
            scratch_shapes=[pltpu.VMEM((tm, H2W2), jnp.float32)],   # running max
        ),
        compiler_params=pltpu.CompilerParams(
            dimension_semantics=("parallel", "arbitrary")),
        cost_estimate=pl.CostEstimate(
            flops=flops,
            transcendentals=M * L * HW,
            bytes_accessed=bytes_accessed),
    )(x2, psi_all, phi_ds, up, w_blk, b_blk)
    return out.reshape(N, Co, H, W)


# ----------------------------------------------------------------------------
if __name__ == "__main__":
    # module config: scatter_transform_max(in_channels=4, out_channels=8, size=16, level=1)
    in_channels, out_channels, size, level = 4, 8, 16, 1
    input_size = int(size / 2 ** (level - 1))        # 16 (spatial size of x and output)
    N = 2                                            # fold more batch into one call for throughput

    key = jax.random.PRNGKey(0)
    kx, kw, kb = jax.random.split(key, 3)
    x = jax.random.normal(kx, (N, in_channels, input_size, input_size), jnp.float32)

    # deterministic conv1x1 params (PyTorch-default-style uniform bound 1/sqrt(fan_in))
    bound = 1.0 / np.sqrt(in_channels)
    w1x1 = jax.random.uniform(kw, (out_channels, in_channels), jnp.float32, -bound, bound)
    bias = jax.random.uniform(kb, (out_channels,), jnp.float32, -bound, bound)

    # one-time precompute (filters + batch-folded conv params)
    psi_all, phi_ds, up = build_operators(input_size, L=8)
    w_blk, b_blk = build_conv_params(w1x1, bias, N)

    out = scatter_transform_max(x, psi_all, phi_ds, up, w_blk, b_blk)
    out = jax.block_until_ready(out)

    assert out.shape == (N, out_channels, input_size, input_size), out.shape
    assert bool(jnp.all(jnp.isfinite(out)))
    print("KERNEL_OK")
</pallas_src>

<mosaic_0001>
module attributes {stable_mosaic.version = 11 : i64} {
  func.func @_scatter_kernel(%arg0: i32, %arg1: i32, %arg2: memref<8x256xf32, #tpu.memory_space<vmem>>, %arg3: memref<256x512xbf16, #tpu.memory_space<vmem>>, %arg4: memref<256x64xbf16, #tpu.memory_space<vmem>>, %arg5: memref<64x256xbf16, #tpu.memory_space<vmem>>, %arg6: memref<16x8xbf16, #tpu.memory_space<vmem>>, %arg7: memref<16x1xf32, #tpu.memory_space<vmem>>, %arg8: memref<16x256xf32, #tpu.memory_space<vmem>>, %arg9: memref<8x64xf32, #tpu.memory_space<vmem>>) attributes {dimension_semantics = [#tpu.dimension_semantics<parallel>, #tpu.dimension_semantics<arbitrary>], iteration_bounds = array<i64: 1, 8>, scalar_prefetch = 0 : i64, scratch_operands = 1 : i64, tpu.core_type = #tpu.core_type<tc>, window_params = [{transform_indices = @transform_0, window_bounds = array<i64: 8, 256>}, {transform_indices = @transform_1, window_bounds = array<i64: 256, 512>}, {pipeline_mode = #tpu.pipeline_mode<synchronous>, transform_indices = @transform_2, window_bounds = array<i64: 256, 64>}, {pipeline_mode = #tpu.pipeline_mode<synchronous>, transform_indices = @transform_3, window_bounds = array<i64: 64, 256>}, {transform_indices = @transform_4, window_bounds = array<i64: 16, 8>}, {transform_indices = @transform_5, window_bounds = array<i64: 16, 1>}, {transform_indices = @transform_6, window_bounds = array<i64: 16, 256>}]} {
    %c0 = arith.constant 0 : index
    %c0_0 = arith.constant 0 : index
    %0 = vector.load %arg2[%c0, %c0_0] : memref<8x256xf32, #tpu.memory_space<vmem>>, vector<8x256xf32>
    %1 = arith.truncf %0 : vector<8x256xf32> to vector<8x256xbf16>
    %c0_1 = arith.constant 0 : index
    %c0_2 = arith.constant 0 : index
    %2 = vector.load %arg3[%c0_1, %c0_2] : memref<256x512xbf16, #tpu.memory_space<vmem>>, vector<256x512xbf16>
    %cst = arith.constant dense<0.000000e+00> : vector<8x512xf32>
    %3 = tpu.matmul %1, %2, %cst {dimension_numbers = #tpu.dot_dimension_numbers<[1], [0], [0], [1], [0, 0, 1, 1], [], []>} : vector<8x256xbf16>, vector<256x512xbf16>, vector<8x512xf32> -> vector<8x512xf32>
    %4 = vector.extract_strided_slice %3 {offsets = [0, 0], sizes = [8, 256], strides = [1, 1]} : vector<8x512xf32> to vector<8x256xf32>
    %5 = vector.extract_strided_slice %3 {offsets = [0, 256], sizes = [8, 256], strides = [1, 1]} : vector<8x512xf32> to vector<8x256xf32>
    %6 = arith.mulf %4, %4 : vector<8x256xf32>
    %7 = arith.mulf %5, %5 : vector<8x256xf32>
    %8 = arith.addf %6, %7 : vector<8x256xf32>
    %9 = math.sqrt %8 : vector<8x256xf32>
    %10 = arith.truncf %9 : vector<8x256xf32> to vector<8x256xbf16>
    %c0_3 = arith.constant 0 : index
    %c0_4 = arith.constant 0 : index
    %11 = vector.load %arg4[%c0_3, %c0_4] : memref<256x64xbf16, #tpu.memory_space<vmem>>, vector<256x64xbf16>
    %cst_5 = arith.constant dense<0.000000e+00> : vector<8x64xf32>
    %12 = tpu.matmul %10, %11, %cst_5 {dimension_numbers = #tpu.dot_dimension_numbers<[1], [0], [0], [1], [0, 0, 1, 1], [], []>} : vector<8x256xbf16>, vector<256x64xbf16>, vector<8x64xf32> -> vector<8x64xf32>
    %c0_i32 = arith.constant 0 : i32
    %13 = arith.cmpi eq, %arg1, %c0_i32 : i32
    %14 = arith.extui %13 : i1 to i32
    %c0_i32_6 = arith.constant 0 : i32
    %15 = arith.cmpi ne, %14, %c0_i32_6 : i32
    scf.if %15 {
      %c0_10 = arith.constant 0 : index
      %c0_11 = arith.constant 0 : index
      %22 = vector.load %arg9[%c0_10, %c0_11] : memref<8x64xf32, #tpu.memory_space<vmem>>, vector<8x64xf32>
      tpu.vector_store %arg9[%c0_10, %c0_11], %12 {strides = array<i32>} : memref<8x64xf32, #tpu.memory_space<vmem>>, vector<8x64xf32>,
    } else {
    }
    %c0_i32_7 = arith.constant 0 : i32
    %16 = arith.cmpi ne, %arg1, %c0_i32_7 : i32
    %17 = arith.extui %16 : i1 to i32
    %c0_i32_8 = arith.constant 0 : i32
    %18 = arith.cmpi ne, %17, %c0_i32_8 : i32
    scf.if %18 {
      %c0_10 = arith.constant 0 : index
      %c0_11 = arith.constant 0 : index
      %22 = vector.load %arg9[%c0_10, %c0_11] : memref<8x64xf32, #tpu.memory_space<vmem>>, vector<8x64xf32>
      %23 = arith.maximumf %22, %12 : vector<8x64xf32>
      %c0_12 = arith.constant 0 : index
      %c0_13 = arith.constant 0 : index
      %24 = vector.load %arg9[%c0_12, %c0_13] : memref<8x64xf32, #tpu.memory_space<vmem>>, vector<8x64xf32>
      tpu.vector_store %arg9[%c0_12, %c0_13], %23 {strides = array<i32>} : memref<8x64xf32, #tpu.memory_space<vmem>>, vector<8x64xf32>,
    } else {
    }
    %c7_i32 = arith.constant 7 : i32
    %19 = arith.cmpi eq, %arg1, %c7_i32 : i32
    %20 = arith.extui %19 : i1 to i32
    %c0_i32_9 = arith.constant 0 : i32
    %21 = arith.cmpi ne, %20, %c0_i32_9 : i32
    scf.if %21 {
      %c0_10 = arith.constant 0 : index
      %c0_11 = arith.constant 0 : index
      %22 = vector.load %arg9[%c0_10, %c0_11] : memref<8x64xf32, #tpu.memory_space<vmem>>, vector<8x64xf32>
      %23 = arith.truncf %22 : vector<8x64xf32> to vector<8x64xbf16>
      %c0_12 = arith.constant 0 : index
      %c0_13 = arith.constant 0 : index
      %24 = vector.load %arg5[%c0_12, %c0_13] : memref<64x256xbf16, #tpu.memory_space<vmem>>, vector<64x256xbf16>
      %cst_14 = arith.constant dense<0.000000e+00> : vector<8x256xf32>
      %25 = tpu.matmul %23, %24, %cst_14 {dimension_numbers = #tpu.dot_dimension_numbers<[1], [0], [0], [1], [0, 0, 1, 1], [], []>} : vector<8x64xbf16>, vector<64x256xbf16>, vector<8x256xf32> -> vector<8x256xf32>
      %c0_15 = arith.constant 0 : index
      %c0_16 = arith.constant 0 : index
      %26 = vector.load %arg6[%c0_15, %c0_16] : memref<16x8xbf16, #tpu.memory_space<vmem>>, vector<16x8xbf16>
      %27 = arith.truncf %25 : vector<8x256xf32> to vector<8x256xbf16>
      %cst_17 = arith.constant dense<0.000000e+00> : vector<16x256xf32>
      %28 = tpu.matmul %26, %27, %cst_17 {dimension_numbers = #tpu.dot_dimension_numbers<[1], [0], [0], [1], [0, 0, 1, 1], [], []>} : vector<16x8xbf16>, vector<8x256xbf16>, vector<16x256xf32> -> vector<16x256xf32>
      %c0_18 = arith.constant 0 : index
      %c0_19 = arith.constant 0 : index
      %29 = vector.load %arg7[%c0_18, %c0_19] : memref<16x1xf32, #tpu.memory_space<vmem>>, vector<16x1xf32>
      %30 = vector.broadcast %29 : vector<16x1xf32> to vector<16x256xf32>
      %31 = arith.addf %28, %30 : vector<16x256xf32>
      %c0_20 = arith.constant 0 : index
      %c0_21 = arith.constant 0 : index
      %32 = vector.load %arg8[%c0_20, %c0_21] : memref<16x256xf32, #tpu.memory_space<vmem>>, vector<16x256xf32>
      tpu.vector_store %arg8[%c0_20, %c0_21], %31 {strides = array<i32>} : memref<16x256xf32, #tpu.memory_space<vmem>>, vector<16x256xf32>,
    } else {
    }
    return
  }
  func.func @transform_0(%arg0: i32, %arg1: i32) -> (i32, i32) {
    %c0_i32 = arith.constant 0 : i32
    %c0_i32_0 = arith.constant 0 : i32
    return %arg0, %c0_i32 : i32, i32
  }
  func.func @transform_1(%arg0: i32, %arg1: i32) -> (i32, i32) {
    %c0_i32 = arith.constant 0 : i32
    %c0_i32_0 = arith.constant 0 : i32
    return %c0_i32, %arg1 : i32, i32
  }
  func.func @transform_2(%arg0: i32, %arg1: i32) -> (i32, i32) {
    %c0_i32 = arith.constant 0 : i32
    %c0_i32_0 = arith.constant 0 : i32
    %c0_i32_1 = arith.constant 0 : i32
    return %c0_i32, %c0_i32_0 : i32, i32
  }
  func.func @transform_3(%arg0: i32, %arg1: i32) -> (i32, i32) {
    %c0_i32 = arith.constant 0 : i32
    %c0_i32_0 = arith.constant 0 : i32
    %c0_i32_1 = arith.constant 0 : i32
    return %c0_i32, %c0_i32_0 : i32, i32
  }
  func.func @transform_4(%arg0: i32, %arg1: i32) -> (i32, i32) {
    %c0_i32 = arith.constant 0 : i32
    return %arg0, %arg0 : i32, i32
  }
  func.func @transform_5(%arg0: i32, %arg1: i32) -> (i32, i32) {
    %c0_i32 = arith.constant 0 : i32
    %c0_i32_0 = arith.constant 0 : i32
    return %arg0, %c0_i32 : i32, i32
  }
  func.func @transform_6(%arg0: i32, %arg1: i32) -> (i32, i32) {
    %c0_i32 = arith.constant 0 : i32
    %c0_i32_0 = arith.constant 0 : i32
    return %arg0, %c0_i32 : i32, i32
  }
}

</mosaic_0001>

<bundles_post_ra>
// kernel: tpu_custom_call.1
= control target key start
LH: loop header
LB: loop body
LE: loop exit
PB: predicated region body
PF: predicated region fallthrough
CT: control target
= control target key end

     0   :  { %11 = vsyncpa [#allocation4], 0  ;;  %s2265_s0 = inlined_call_operand.hbm [shape: f32[8,256], index: 0, kind: input, shape index: {}]   ;;  %s2266_s1 = inlined_call_operand.hbm [shape: bf16[256,4096], index: 1, kind: input, shape index: {}]   ;;  %s2267_s2 = inlined_call_operand.vmem [shape: bf16[256,64], index: 2, kind: input, shape index: {}]   ;;  %s2268_s3 = inlined_call_operand.hbm [shape: bf16[64,256], index: 3, kind: input, shape index: {}]   ;;  %s2269_s4 = inlined_call_operand.vmem [shape: bf16[16,8], index: 4, kind: input, shape index: {}]   ;;  %s2270_s5 = inlined_call_operand.vmem [shape: f32[16,1], index: 5, kind: input, shape index: {}]   ;;  %s2271_s6 = inlined_call_operand.hbm [shape: f32[16,256], index: 6, kind: output, shape index: {}]  }
   0x1   :  { %12 = vsyncpa [#allocation7], 0 }
   0x2   :  { %14 = vsyncpa [#allocation7 + $0x1], 0 }
   0x3   :  { %15 = vsyncpa [#allocation5], 0  ;;  %s1930_s21 = smov 0   ;;  %s1932_s22 = smov 0  }
   0x4   :  { %s1934_s23 = smov 0   ;;  %s1936_s24 = smov 0  }
   0x5   :  { %s1938_s25 = smov 0   ;;  %s1940_s26 = smov 0  }
   0x6 LB: > { %s1959_s27 = sadd.s32 4294967295, %s1881_s26   ;;  %p73_p0 = scmp.ne.s32.totalorder %s1869_s23, %s1865_s22  ;;  %s1881_s26 = sphi %s1940_s26, %s21_s26   ;;  %s1877_s25 = sphi %s1938_s25, %s2293_s25   ;;  %s1873_s24 = sphi %s1936_s24, %s2292_s24   ;;  %s1869_s23 = sphi %s1934_s23, %s2291_s23   ;;  %s1865_s22 = sphi %s1932_s22, %s2290_s22   ;;  %s1861_s21 = sphi %s1930_s21, %s2289_s21  }
   0x7   : > { %p74_p1 = scmp.eq.s32.totalorder %s1881_s26, 0  ;;  %p79_p2 = scmp.ne.s32.totalorder %s1865_s22, %s1861_s21 }
   0x8   : > { %p2272_p3 = scmp.eq.s32.totalorder %s1959_s27, 0  ;;  %p1351_p5 = scmp.ge.s32.totalorder %s1881_s26, 1 }
   0x9   : > { %p75_p4 = por %p74_p1, %p73_p0  ;;  %p212_p7 = scmp.lt.s32.totalorder %s1881_s26, 9 }
   0xa   : > { %p1970_p6 = por %p2272_p3, %p79_p2  ;;  %s1883_s7 = smov [#allocation8]  }
   0xb   : > { %p1975_p8 = pnand %p1351_p5, %p212_p7  ;;  %s241_s8 = sshll.u32 %s1883_s7, 4  ;;  %s242_s8 = int_to_ptr.vmem [resolvable:$true] %s241_s8 }
   0xc   : > { %s2276_s29 = scalar_select %p1970_p6, 1, 0 }
   0xd   : > { %s2277_s30 = scalar_select %p1975_p8, 1, 0 }
   0xe   : > { %p1500_p9 = pneg %p1975_p8  ;;  %p1513_p10 = scmp.lt.s32.totalorder %s1881_s26, 8 }
   0xf   : > { %s1707_s13 = scalar_lea.hbm %s2268_s3, 1024 }
  0x10   : > { %p1984_p11 = pnand %p1500_p9, %p2272_p3  ;;  %p1988_p12 = pnand %p1513_p10, %p75_p4 }
  0x11   : > { %p1708_p13 = scmp.ne.s32.totalorder %s2268_s3, %s1707_s13  ;;  %p1714_p4 = scmp.lt.u32.totalorder %s1707_s13, %s2268_s3 }
  0x12   : > { %s2279_s10 = scalar_select %p1988_p12, 1, 0 }
  0x13   : > { %p1709_p0 = pneg %p1984_p11 }
  0x15   : > { %p1710_p1 = pnand %p1709_p0, %p1708_p13 }
  0x17   : > { %p1711_p2 = pneg %p1710_p1 }
  0x19   : > { %p1716_p5 = pnand %p1714_p4, %p1711_p2 }
  0x1b   : > { %1719 = shalt.err (!%p1716_p5)
}
  0x1c   : > { %s1720_s18 = scalar_lea.vmem %s242_s8, 1024  ;;  %p1728_p3 = scmp.lt.s32.totalorder %s242_s8, %s242_s8 }
  0x1d   : > { %p1721_p7 = scmp.ne.s32.totalorder %s242_s8, %s1720_s18  ;;  %p1729_p6 = scmp.lt.s32.totalorder %s1720_s18, %s1720_s18 }
  0x1f   : > { %p1723_p9 = pnand %p1721_p7, %p1709_p0  ;;  %p1730_p8 = por %p1729_p6, %p1728_p3 }
  0x21   : > { %p1724_p10 = pneg %p1723_p9 }
  0x23   : > { %p1731_p12 = pnand %p1730_p8, %p1724_p10 }
  0x25   : > { %1734 = shalt.err (!%p1731_p12)
}
  0x26   : > { %s1884_s19 = smov 128   ;;  %s1885_s20 = smov 8  }
  0x27   : > { %1506 = dma.hbm_to_vmem [thread:$0]  (!%p1984_p11), %s2268_s3, 1024, %s242_s8, [#allocation7], %s1884_s19, %s1884_s19, %s1885_s20  }
  0x28   : > { %s1886_s11 = smov [#allocation3]   ;;  %s1735_s15 = scalar_lea.hbm %s2265_s0, 256 }
  0x29   : > { %s228_s12 = sshll.u32 %s1886_s11, 4  ;;  %p1736_p3 = scmp.ne.s32.totalorder %s2265_s0, %s1735_s15  ;;  %s229_s12 = int_to_ptr.vmem [resolvable:$true] %s228_s12 }
  0x2a   : > { %p1742_p12 = scmp.lt.u32.totalorder %s1735_s15, %s2265_s0 }
  0x2b   : > { %p1738_p6 = pnand %p1736_p3, %p1709_p0 }
  0x2d   : > { %p1739_p8 = pneg %p1738_p6 }
  0x2f   : > { %p1744_p13 = pnand %p1742_p12, %p1739_p8 }
  0x31   : > { %1747 = shalt.err (!%p1744_p13)
}
  0x32   : > { %s1748_s8 = scalar_lea.vmem %s229_s12, 256  ;;  %p1756_p5 = scmp.lt.s32.totalorder %s229_s12, %s229_s12 }
  0x33   : > { %p1749_p1 = scmp.ne.s32.totalorder %s229_s12, %s1748_s8  ;;  %p1757_p7 = scmp.lt.s32.totalorder %s1748_s8, %s1748_s8 }
  0x35   : > { %p1751_p2 = pnand %p1749_p1, %p1709_p0  ;;  %p1758_p9 = por %p1757_p7, %p1756_p5 }
  0x37   : > { %p1752_p4 = pneg %p1751_p2 }
  0x39   : > { %p1759_p10 = pnand %p1758_p9, %p1752_p4 }
  0x3b   : > { %1762 = shalt.err (!%p1759_p10)
}
  0x3c   : > { %1503 = dma.hbm_to_vmem [thread:$0]  (!%p1984_p11), %s2265_s0, 256, %s229_s12, [#allocation4]  }
  0x3d   : > { %s276_s28 = sand.u32 1, %s1881_s26   ;;  %s30_s21 = sadd.s32 1, %s1877_s25 }
  0x3e   : > { %p31_p0 = scmp.ge.s32.totalorder %s30_s21, 8  ;;  %s278_s7 = sand.u32 1, %s1869_s23  }
  0x3f   : > { %s1357_s11 = sshll.u32 %s278_s7, 9  ;;  %s1463_s13 = sshll.u32 %s1877_s25, 8 }
  0x40   : > { %s2295_s21 = smov (%p31_p0, %s30_s21), 0  ;;  %s2043_s15 = scalar_lea.hbm %s2266_s1, %s1463_s13 }
  0x41   : > { %s63_s12 = ssub.s32 %s1877_s25, %s2295_s21  ;;  %s280_s16 = scalar_lea.vmem [#allocation6], %s1357_s11 }
  0x42   : > { %s287_s17 = sshll.u32 %s280_s16, 4  ;;  %p64_p11 = scmp.eq.s32.totalorder %s63_s12, 0  ;;  %s2047_s17 = int_to_ptr.vmem [resolvable:$true] %s287_s17 }
  0x43   : > { %s2280_s18 = sadd.s32 1, %s1869_s23  ;;  %s2054_s19 = scalar_lea.sflag [#allocation7], %s276_s28 }
  0x44   : > { %s2052_s8 = scalar_select %p64_p11, %s1869_s23, %s2280_s18  }
  0x45   : > { %s1763_s20 = scalar_lea.hbm %s2043_s15, 8192  ;;  %p2281_p6 = scmp.ne.s32.totalorder %s2279_s10, 0 }
  0x46   : > { %p1764_p3 = scmp.ne.s32.totalorder %s2043_s15, %s1763_s20  ;;  %s1768_s11 = scalar_lea.hbm %s2266_s1, 65536 }
  0x47   : > { %p1765_p8 = pneg %p2281_p6  ;;  %p1769_p1 = scmp.lt.u32.totalorder %s2043_s15, %s2266_s1 }
  0x48   : > { %p1770_p2 = scmp.lt.u32.totalorder %s1768_s11, %s1763_s20  ;;  %p1772_p5 = scmp.lt.u32.totalorder %s1763_s20, %s2043_s15 }
  0x49   : > { %p1766_p12 = pnand %p1765_p8, %p1764_p3 }
  0x4a   : > { %p1771_p4 = por %p1770_p2, %p1769_p1 }
  0x4b   : > { %p1767_p13 = pneg %p1766_p12 }
  0x4c   : > { %p1773_p7 = por %p1772_p5, %p1771_p4 }
  0x4e   : > { %p1774_p9 = pnand %p1773_p7, %p1767_p13 }
  0x50   : > { %1777 = shalt.err (!%p1774_p9)
}
  0x51   : > { %s1778_s28 = scalar_lea.vmem %s2047_s17, 8192  ;;  %s1887_s12 = smov [#allocation6]  }
  0x52   : > { %p1779_p10 = scmp.ne.s32.totalorder %s2047_s17, %s1778_s28  ;;  %s1783_s16 = sshll.u32 %s1887_s12, 4  ;;  %s1784_s16 = int_to_ptr.vmem [resolvable:$false] %s1783_s16 }
  0x53   : > { %s1785_s18 = scalar_lea.vmem %s1784_s16, 16384  ;;  %p1786_p3 = scmp.lt.s32.totalorder %s2047_s17, %s1784_s16 }
  0x54   : > { %p1781_p0 = pnand %p1779_p10, %p1765_p8  ;;  %p1787_p12 = scmp.lt.s32.totalorder %s1785_s18, %s1778_s28 }
  0x56   : > { %p1782_p11 = pneg %p1781_p0  ;;  %p1788_p1 = por %p1787_p12, %p1786_p3 }
  0x58   : > { %p1789_p2 = pnand %p1788_p1, %p1782_p11 }
  0x5a   : > { %1792 = shalt.err (!%p1789_p2)
}
  0x5b   : > { %s1888_s20 = smov 2048   ;;  %s1889_s7 = smov 256  }
  0x5c   : > { %s1890_s13 = smov 16   ;;  %p2282_p8 = scmp.ne.s32.totalorder %s2277_s30, 0 }
  0x5d   : > { %1510 = dma.hbm_to_vmem [thread:$0]  (!%p2281_p6), %s2043_s15, 8192, %s2047_s17, %s2054_s19, %s1888_s20, %s1889_s7, %s1890_s13  }
  0x5e   : > { %299 = sbr.rel (%p2282_p8) target bundleno = 1118 (0x45e), region = 44  ;;  %p2283_p13 = scmp.eq.s32.totalorder (!%p2282_p8), %s1959_s27, 0 }
  0x65   : > { %1844 = dma.done.wait (%p2283_p13), [#allocation4], 256   ;;  %p2284_p4 = pmov %p2283_p13 }
  0x66   : > { %s305_s11 = sand.u32 1, %s1959_s27   ;;  %s307_s9 = sand.u32 1, %s1865_s22  }
  0x67   : > { %1846 = vsyncadd (%p2284_p4), [#allocation4], 4294967040  ;;  %s1362_s14 = sshll.u32 %s307_s9, 9  ;;  %s306_s28 = scalar_lea.sflag [#allocation7], %s305_s11 }
  0x68   : > { %s2090_s12 = scalar_lea.vmem [#allocation6], %s1362_s14  ;;  %p2285_p5 = scmp.ne.s32.totalorder %s2276_s29, 0 }
  0x6a   : > { %1848 = dma.done.wait (%p2285_p5), %s306_s28, 8192  }
  0x6b   : > { %1850 = vsyncadd (%p2285_p5), %s306_s28, 4294959104  ;;  %p2286_p6 = pmov %p2284_p4 }
  0x6c   : > { %p2287_p7 = pmov %p2284_p4 }
  0x6d   : > { %1852 = dma.done.wait (%p2286_p6), [#allocation7], 1024  }
  0x6e   : > { %1854 = vsyncadd (%p2287_p7), [#allocation7], 4294966272  ;;  %v1577_v0 = vld [vmem:[%s2090_s12 + $0x4] ss:$16 sps:$4 sm:$0xff]   ;;  %v1579_v1 = vld [vmem:[%s2090_s12 + $0xc] ss:$16 sps:$4 sm:$0xff]  }
  0x6f   : > { %756 = vmatprep.subr.bf16.mxu0 %v1577_v0  ;;  %v1581_v2 = vld [vmem:[%s2090_s12] ss:$16 sps:$4 sm:$0xff]   ;;  %v1582_v3 = vld [vmem:[%s2090_s12 + $0x8] ss:$16 sps:$4 sm:$0xff]   ;;  %797 = vmatprep.subr.bf16.mxu1 %v1579_v1  ;;  %v1583_v4 = vld [vmem:[%s2090_s12 + $0x24] ss:$16 sps:$4 sm:$0xff]  }
  0x70   : > { %757 = vmatpush1.bf16.msra.mxu0 %v1581_v2  ;;  %798 = vmatpush1.bf16.msra.mxu1 %v1582_v3  ;;  %v1585_v5 = vld [vmem:[%s2090_s12 + $0x2c] ss:$16 sps:$4 sm:$0xff]   ;;  %v1587_v6 = vld [vmem:[%s2090_s12 + $0x20] ss:$16 sps:$4 sm:$0xff]   ;;  %v1588_v7 = vld [vmem:[%s2090_s12 + $0x28] ss:$16 sps:$4 sm:$0xff]  }
  0x71   : > { %758 = vmatprep.subr.bf16.mxu0 %v1583_v4  ;;  %799 = vmatprep.subr.bf16.mxu1 %v1585_v5  ;;  %v1589_v8 = vld [vmem:[%s2090_s12 + $0x44] ss:$16 sps:$4 sm:$0xff]   ;;  %v1591_v9 = vld [vmem:[%s2090_s12 + $0x4c] ss:$16 sps:$4 sm:$0xff]   ;;  %v1593_v10 = vld [vmem:[%s2090_s12 + $0x40] ss:$16 sps:$4 sm:$0xff]  }
  0x72   : > { %v1594_v11 = vld [vmem:[%s2090_s12 + $0x48] ss:$16 sps:$4 sm:$0xff]   ;;  %v1595_v12 = vld [vmem:[%s2090_s12 + $0x64] ss:$16 sps:$4 sm:$0xff]   ;;  %v1597_v13 = vld [vmem:[%s2090_s12 + $0x6c] ss:$16 sps:$4 sm:$0xff]  }
  0x73   : > { %v1599_v14 = vld [vmem:[%s2090_s12 + $0x60] ss:$16 sps:$4 sm:$0xff]   ;;  %v1600_v15 = vld [vmem:[%s2090_s12 + $0x68] ss:$16 sps:$4 sm:$0xff]   ;;  %v1601_v16 = vld [vmem:[%s2090_s12 + $0x84] ss:$16 sps:$4 sm:$0xff]  }
  0x74   : > { %759 = vmatpush1.bf16.msra.mxu0 %v1587_v6  ;;  %800 = vmatpush1.bf16.msra.mxu1 %v1588_v7  ;;  %v1603_v17 = vld [vmem:[%s2090_s12 + $0x8c] ss:$16 sps:$4 sm:$0xff]   ;;  %v1605_v18 = vld [vmem:[%s2090_s12 + $0x80] ss:$16 sps:$4 sm:$0xff]   ;;  %v1606_v19 = vld [vmem:[%s2090_s12 + $0x88] ss:$16 sps:$4 sm:$0xff]  }
  0x75   : > { %760 = vmatprep.subr.bf16.mxu0 %v1589_v8  ;;  %801 = vmatprep.subr.bf16.mxu1 %v1591_v9  ;;  %v1607_v20 = vld [vmem:[%s2090_s12 + $0xa4] ss:$16 sps:$4 sm:$0xff]   ;;  %v1609_v21 = vld [vmem:[%s2090_s12 + $0xac] ss:$16 sps:$4 sm:$0xff]   ;;  %v1611_v22 = vld [vmem:[%s2090_s12 + $0xa0] ss:$16 sps:$4 sm:$0xff]  }
  0x76   : > { %v1612_v23 = vld [vmem:[%s2090_s12 + $0xa8] ss:$16 sps:$4 sm:$0xff]   ;;  %v1613_v24 = vld [vmem:[%s2090_s12 + $0xc4] ss:$16 sps:$4 sm:$0xff]   ;;  %v1615_v25 = vld [vmem:[%s2090_s12 + $0xcc] ss:$16 sps:$4 sm:$0xff]  }
  0x77   : > { %v1617_v26 = vld [vmem:[%s2090_s12 + $0xc0] ss:$16 sps:$4 sm:$0xff]   ;;  %v1618_v27 = vld [vmem:[%s2090_s12 + $0xc8] ss:$16 sps:$4 sm:$0xff]   ;;  %v1619_v28 = vld [vmem:[%s2090_s12 + $0xe4] ss:$16 sps:$4 sm:$0xff]  }
  0x78   : > { %761 = vmatpush1.bf16.msra.mxu0 %v1593_v10  ;;  %802 = vmatpush1.bf16.msra.mxu1 %v1594_v11  ;;  %v1621_v29 = vld [vmem:[%s2090_s12 + $0xec] ss:$16 sps:$4 sm:$0xff]   ;;  %v1623_v30 = vld [vmem:[%s2090_s12 + $0xe0] ss:$16 sps:$4 sm:$0xff]   ;;  %v1624_v31 = vld [vmem:[%s2090_s12 + $0xe8] ss:$16 sps:$4 sm:$0xff]  }
  0x79   : > { %762 = vmatprep.subr.bf16.mxu0 %v1595_v12  ;;  %803 = vmatprep.subr.bf16.mxu1 %v1597_v13  ;;  %v1625_v32 = vld [vmem:[%s2090_s12 + $0x104] ss:$16 sps:$4 sm:$0xff]   ;;  %v1627_v33 = vld [vmem:[%s2090_s12 + $0x10c] ss:$16 sps:$4 sm:$0xff]   ;;  %v1629_v34 = vld [vmem:[%s2090_s12 + $0x100] ss:$16 sps:$4 sm:$0xff]  }
  0x7a   : > { %v1630_v35 = vld [vmem:[%s2090_s12 + $0x108] ss:$16 sps:$4 sm:$0xff]   ;;  %v1631_v36 = vld [vmem:[%s2090_s12 + $0x124] ss:$16 sps:$4 sm:$0xff]   ;;  %v1633_v37 = vld [vmem:[%s2090_s12 + $0x12c] ss:$16 sps:$4 sm:$0xff]  }
  0x7b   : > { %v1635_v38 = vld [vmem:[%s2090_s12 + $0x120] ss:$16 sps:$4 sm:$0xff]   ;;  %v1636_v39 = vld [vmem:[%s2090_s12 + $0x128] ss:$16 sps:$4 sm:$0xff]   ;;  %v1637_v40 = vld [vmem:[%s2090_s12 + $0x144] ss:$16 sps:$4 sm:$0xff]  }
  0x7c   : > { %763 = vmatpush1.bf16.msra.mxu0 %v1599_v14  ;;  %804 = vmatpush1.bf16.msra.mxu1 %v1600_v15  ;;  %v1639_v41 = vld [vmem:[%s2090_s12 + $0x14c] ss:$16 sps:$4 sm:$0xff]   ;;  %v1641_v42 = vld [vmem:[%s2090_s12 + $0x140] ss:$16 sps:$4 sm:$0xff]   ;;  %v1642_v43 = vld [vmem:[%s2090_s12 + $0x148] ss:$16 sps:$4 sm:$0xff]  }
  0x7d   : > { %764 = vmatprep.subr.bf16.mxu0 %v1601_v16  ;;  %805 = vmatprep.subr.bf16.mxu1 %v1603_v17  ;;  %v1643_v44 = vld [vmem:[%s2090_s12 + $0x164] ss:$16 sps:$4 sm:$0xff]   ;;  %v1645_v45 = vld [vmem:[%s2090_s12 + $0x16c] ss:$16 sps:$4 sm:$0xff]   ;;  %v1647_v46 = vld [vmem:[%s2090_s12 + $0x160] ss:$16 sps:$4 sm:$0xff]  }
  0x7e   : > { %v369_v47 = vld [vmem:[#allocation3 + $0x8] sm:$0xff]  ;;  %v1649_v50 = vld [vmem:[%s2090_s12 + $0x184] ss:$16 sps:$4 sm:$0xff]   ;;  %v1653_v52 = vld [vmem:[%s2090_s12 + $0x180] ss:$16 sps:$4 sm:$0xff]   ;;  %p1444_p9 = scmp.ne.s32.totalorder %s1873_s24, 0 }
  0x7f   : > { %v1648_v48 = vld [vmem:[%s2090_s12 + $0x168] ss:$16 sps:$4 sm:$0xff]   ;;  %v371_v49 = vpack.c.bf16 %v369_v47, %v369_v47  ;;  %v1651_v51 = vld [vmem:[%s2090_s12 + $0x18c] ss:$16 sps:$4 sm:$0xff]   ;;  %v1655_v54 = vld [vmem:[%s2090_s12 + $0x1a4] ss:$16 sps:$4 sm:$0xff]  }
  0x80   : > { %765 = vmatpush1.bf16.msra.mxu0 %v1605_v18  ;;  %806 = vmatpush1.bf16.msra.mxu1 %v1606_v19  ;;  %v1654_v53 = vld [vmem:[%s2090_s12 + $0x188] ss:$16 sps:$4 sm:$0xff]   ;;  %v1657_v55 = vld [vmem:[%s2090_s12 + $0x1ac] ss:$16 sps:$4 sm:$0xff]   ;;  %v1659_v56 = vld [vmem:[%s2090_s12 + $0x1a0] ss:$16 sps:$4 sm:$0xff]  }
  0x81   : > { %766 = vmatprep.subr.bf16.mxu0 %v1607_v20  ;;  %807 = vmatprep.subr.bf16.mxu1 %v1609_v21  ;;  %v1660_v57 = vld [vmem:[%s2090_s12 + $0x1a8] ss:$16 sps:$4 sm:$0xff]   ;;  %v1661_v58 = vld [vmem:[%s2090_s12 + $0x1c4] ss:$16 sps:$4 sm:$0xff]   ;;  %v1663_v59 = vld [vmem:[%s2090_s12 + $0x1cc] ss:$16 sps:$4 sm:$0xff]  }
  0x82   : > { %788 = vmatprep.mubr.bf16.mxu0 %v371_v49  ;;  %829 = vmatprep.mubr.bf16.mxu1 %v371_v49  ;;  %v1665_v60 = vld [vmem:[%s2090_s12 + $0x1c0] ss:$16 sps:$4 sm:$0xff]   ;;  %v1666_v61 = vld [vmem:[%s2090_s12 + $0x1c8] ss:$16 sps:$4 sm:$0xff]   ;;  %v1667_v62 = vld [vmem:[%s2090_s12 + $0x1e4] ss:$16 sps:$4 sm:$0xff]  }
  0x83   : > { %v1669_v63 = vld [vmem:[%s2090_s12 + $0x1ec] ss:$16 sps:$4 sm:$0xff]   ;;  %v1671_v0 = vld [vmem:[%s2090_s12 + $0x1e0] ss:$16 sps:$4 sm:$0xff]   ;;  %v1672_v1 = vld [vmem:[%s2090_s12 + $0x1e8] ss:$16 sps:$4 sm:$0xff]  }
  0x84   : > { %767 = vmatpush1.bf16.msra.mxu0 %v1611_v22  ;;  %808 = vmatpush1.bf16.msra.mxu1 %v1612_v23  ;;  %v368_v2 = vld [vmem:[#allocation3] sm:$0xff]  ;;  %v1673_v3 = vld [vmem:[%s2267_s2 + $0x40] sm:$0xff]   ;;  %v1677_v8 = vld [vmem:[%s2267_s2 + $0x50] sm:$0xff]   ;;  %vm1032_vm4 = vcmask (!%p1444_p9), 523264  }
  0x85   : > { %768 = vmatprep.subr.bf16.mxu0 %v1613_v24  ;;  %809 = vmatprep.subr.bf16.mxu1 %v1615_v25  ;;  %v370_v4 = vpack.c.bf16 %v368_v2, %v368_v2  ;;  %v1674_v5 = vld [vmem:[%s2267_s2] sm:$0xff]   ;;  %v1675_v6 = vld [vmem:[%s2267_s2 + $0x48] sm:$0xff]   ;;  %v1678_v9 = vld [vmem:[%s2267_s2 + $0x10] sm:$0xff]  }
  0x86   : > { %v1676_v7 = vld [vmem:[%s2267_s2 + $0x8] sm:$0xff]   ;;  %v1679_v10 = vld [vmem:[%s2267_s2 + $0x58] sm:$0xff]   ;;  %v1681_v12 = vld [vmem:[%s2267_s2 + $0x60] sm:$0xff]  }
  0x87   : > { %v1680_v11 = vld [vmem:[%s2267_s2 + $0x18] sm:$0xff]   ;;  %v1682_v13 = vld [vmem:[%s2267_s2 + $0x20] sm:$0xff]   ;;  %v1683_v14 = vld [vmem:[%s2267_s2 + $0x68] sm:$0xff]  }
  0x88   : > { %769 = vmatpush1.bf16.msra.mxu0 %v1617_v26  ;;  %810 = vmatpush1.bf16.msra.mxu1 %v1618_v27  ;;  %v1684_v15 = vld [vmem:[%s2267_s2 + $0x28] sm:$0xff]   ;;  %v1685_v16 = vld [vmem:[%s2267_s2 + $0x70] sm:$0xff]   ;;  %v1687_v18 = vld [vmem:[%s2267_s2 + $0x78] sm:$0xff]  }
  0x89   : > { %770 = vmatprep.subr.bf16.mxu0 %v1619_v28  ;;  %811 = vmatprep.subr.bf16.mxu1 %v1621_v29  ;;  %v1686_v17 = vld [vmem:[%s2267_s2 + $0x30] sm:$0xff]   ;;  %v1688_v19 = vld [vmem:[%s2267_s2 + $0x38] sm:$0xff]  }
  0x8c   : > { %771 = vmatpush1.bf16.msra.mxu0 %v1623_v30  ;;  %812 = vmatpush1.bf16.msra.mxu1 %v1624_v31 }
  0x8d   : > { %772 = vmatprep.subr.bf16.mxu0 %v1625_v32  ;;  %813 = vmatprep.subr.bf16.mxu1 %v1627_v33 }
  0x90   : > { %773 = vmatpush1.bf16.msra.mxu0 %v1629_v34  ;;  %814 = vmatpush1.bf16.msra.mxu1 %v1630_v35 }
  0x91   : > { %774 = vmatprep.subr.bf16.mxu0 %v1631_v36  ;;  %815 = vmatprep.subr.bf16.mxu1 %v1633_v37 }
  0x94   : > { %775 = vmatpush1.bf16.msra.mxu0 %v1635_v38  ;;  %816 = vmatpush1.bf16.msra.mxu1 %v1636_v39 }
  0x95   : > { %776 = vmatprep.subr.bf16.mxu0 %v1637_v40  ;;  %817 = vmatprep.subr.bf16.mxu1 %v1639_v41 }
  0x98   : > { %777 = vmatpush1.bf16.msra.mxu0 %v1641_v42  ;;  %818 = vmatpush1.bf16.msra.mxu1 %v1642_v43 }
  0x99   : > { %778 = vmatprep.subr.bf16.mxu0 %v1643_v44  ;;  %819 = vmatprep.subr.bf16.mxu1 %v1645_v45 }
  0x9c   : > { %779 = vmatpush1.bf16.msra.mxu0 %v1647_v46  ;;  %820 = vmatpush1.bf16.msra.mxu1 %v1648_v48 }
  0x9d   : > { %780 = vmatprep.subr.bf16.mxu0 %v1649_v50  ;;  %821 = vmatprep.subr.bf16.mxu1 %v1651_v51 }
  0xa0   : > { %781 = vmatpush1.bf16.msra.mxu0 %v1653_v52  ;;  %822 = vmatpush1.bf16.msra.mxu1 %v1654_v53 }
  0xa1   : > { %782 = vmatprep.subr.bf16.mxu0 %v1655_v54  ;;  %823 = vmatprep.subr.bf16.mxu1 %v1657_v55 }
  0xa4   : > { %783 = vmatpush1.bf16.msra.mxu0 %v1659_v56  ;;  %824 = vmatpush1.bf16.msra.mxu1 %v1660_v57 }
  0xa5   : > { %784 = vmatprep.subr.bf16.mxu0 %v1661_v58  ;;  %825 = vmatprep.subr.bf16.mxu1 %v1663_v59 }
  0xa8   : > { %785 = vmatpush1.bf16.msra.mxu0 %v1665_v60  ;;  %826 = vmatpush1.bf16.msra.mxu1 %v1666_v61 }
  0xa9   : > { %786 = vmatprep.subr.bf16.mxu0 %v1667_v62  ;;  %827 = vmatprep.subr.bf16.mxu1 %v1669_v63 }
  0xac   : > { %787 = vmatpush1.bf16.msra.mxu0 %v1671_v0  ;;  %828 = vmatpush1.bf16.msra.mxu1 %v1672_v1 }
  0xad   : > { %1464 = vmatprep.subr.bf16.mxu0 %v1673_v3 }
  0xaf   : > { %789 = vmatmul.mubr.bf16.vlgmr.msra.gmra.mrb[0].mxu0 %v370_v4  ;;  %830 = vmatmul.mubr.bf16.vlgmr.msra.gmra.mrb[0].mxu1 %v370_v4 }
  0xb0   : > { %1465 = vmatpush3.bf16.msra.mxu0 %v1674_v5 }
  0xb1   : > { %1466 = vmatprep.subr.bf16.mxu0 %v1675_v6 }
  0xb4   : > { %1467 = vmatpush3.bf16.msra.mxu0 %v1676_v7 }
  0xb5   : > { %1468 = vmatprep.subr.bf16.mxu0 %v1677_v8 }
  0xb8   : > { %1469 = vmatpush3.bf16.msra.mxu0 %v1678_v9 }
  0xb9   : > { %1470 = vmatprep.subr.bf16.mxu0 %v1679_v10 }
  0xbc   : > { %1471 = vmatpush3.bf16.msra.mxu0 %v1680_v11 }
  0xbd   : > { %1472 = vmatprep.subr.bf16.mxu0 %v1681_v12 }
  0xc0   : > { %1473 = vmatpush3.bf16.msra.mxu0 %v1682_v13 }
  0xc1   : > { %1474 = vmatprep.subr.bf16.mxu0 %v1683_v14 }
  0xc4   : > { %1475 = vmatpush3.bf16.msra.mxu0 %v1684_v15 }
  0xc5   : > { %1476 = vmatprep.subr.bf16.mxu0 %v1685_v16 }
  0xc8   : > { %1477 = vmatpush3.bf16.msra.mxu0 %v1686_v17 }
  0xc9   : > { %1478 = vmatprep.subr.bf16.mxu0 %v1687_v18 }
  0xcc   : > { %1479 = vmatpush3.bf16.msra.mxu0 %v1688_v19 }
 0x182   : > { %v790_v20 = vpop.f32.mrb[0].mxu0  ;;  %v831_v21 = vpop.f32.mrb[0].mxu1 }
 0x183   : > { %v838_v22 = vmul.f32 %v790_v20, %v790_v20  ;;  %v840_v23 = vmul.f32 %v831_v21, %v831_v21  ;;  %v792_v24 = vpop.f32.mrb[1].mxu0  ;;  %v833_v25 = vpop.f32.mrb[1].mxu1 }
 0x184   : > { %v839_v26 = vmul.f32 %v792_v24, %v792_v24  ;;  %v841_v27 = vmul.f32 %v833_v25, %v833_v25  ;;  %v794_v28 = vpop.f32.mrb[2].mxu0  ;;  %v835_v29 = vpop.f32.mrb[2].mxu1 }
 0x185   : > { %v842_v30 = vadd.f32 %v840_v23, %v838_v22  ;;  %v795_v31 = vpop.f32.mrb[3].mxu0  ;;  %v836_v32 = vpop.f32.mrb[3].mxu1 }
 0x186   : > { %v843_v33 = vadd.f32 %v841_v27, %v839_v26 }
 0x187   : > { %1689 = vrsqrt.f32 %v842_v30  ;;  %vm846_vm0 = vcmp.eq.f32.partialorder %v842_v30, inf  ;;  %v849_v38 = vand.u32 2147483648, %v842_v30  ;;  %vm848_vm2 = vcmp.eq.f32.partialorder %v842_v30, 0.0 }
 0x188   : > { %1691 = vrsqrt.f32 %v843_v33  ;;  %vm853_vm1 = vcmp.eq.f32.partialorder %v843_v33, inf  ;;  %v856_v39 = vand.u32 2147483648, %v843_v33  ;;  %vm855_vm3 = vcmp.eq.f32.partialorder %v843_v33, 0.0 }
 0x191   : > { %v1690_v34 = vpop.eup %1689 }
 0x192   : > { %v1692_v35 = vpop.eup %1691  ;;  %v845_v36 = vmul.f32 %v1690_v34, %v842_v30 }
 0x193   : > { %v852_v37 = vmul.f32 %v1692_v35, %v843_v33 }
 0x194   : > { %v847_v40 = vsel %vm846_vm0, %v842_v30, %v845_v36 }
 0x195   : > { %v854_v41 = vsel %vm853_vm1, %v843_v33, %v852_v37  ;;  %v850_v42 = vsel %vm848_vm2, %v849_v38, %v847_v40 }
 0x196   : > { %v857_v43 = vsel %vm855_vm3, %v856_v39, %v854_v41  ;;  %v858_v45 = vpack.c.bf16 %v850_v42, %v850_v42 }
 0x197   : > { %v859_v44 = vpack.c.bf16 %v857_v43, %v857_v43 }
 0x199   : > { %1020 = vmatprep.mubr.bf16.mxu0 %v859_v44 }
 0x19a   : > { %1021 = vmatmul.mubr.bf16.vlgmr.msra.gmra.mrb[4].mxu0 %v858_v45 }
 0x26a   : > { %1031 = sbr.rel (%p1444_p9) target bundleno = 626 (0x272), region = 60 }
 0x26d   : > { %v1480_v46 = vpop.f32.mrb[4].mxu0 }
 0x26e   : > { %v1481_v47 = vpop.f32.mrb[5].mxu0 }
 0x26f   : > { %v1482_v48 = vadd.f32 %v1481_v47, %v1480_v46  ;;  %v1483_v49 = vpop.f32.mrb[6].mxu0 }
 0x270   : > { %v1484_v50 = vpop.f32.mrb[7].mxu0 }
 0x271   : > { %1033 = vst.msk [vmem:[#allocation2] sm:$0xff] %vm1032_vm4, %v1482_v48 }
 0x272 PF: > { %p1445_p10 = scmp.eq.s32.totalorder %s1873_s24, 0 }
 0x273   : > { %vm1040_vm5 = vcmask (!%p1445_p10), 523264  }
 0x274   : > { %1037 = sbr.rel (%p1445_p10) target bundleno = 636 (0x27c), region = 64 }
 0x278   : > { %v1038_v51 = vld [vmem:[#allocation2] sm:$0xff] (!%p1445_p10) }
 0x279   : > { %v1039_v52 = vmax.f32 (!%p1445_p10), %v1038_v51, %v1482_v48 }
 0x27b   : > { %1041 = vst.msk [vmem:[#allocation2] sm:$0xff] %vm1040_vm5, %v1039_v52 }
 0x27c PF: > { %p1446_p0 = scmp.ne.s32.totalorder %s1873_s24, 7 }
 0x27d   : > { %v1694_v53 = vld [vmem:[#allocation8 + $0x4] ss:$8 sps:$4 sm:$0xff] (!%p1446_p0)   ;;  %v1696_v54 = vld [vmem:[#allocation8] ss:$8 sps:$4 sm:$0xff] (!%p1446_p0)   ;;  %v1891_v55 = vmov (!%p1446_p0), 0   ;;  %vm1096_vm6 = vcmask (!%p1446_p0), 523264  }
 0x27e   : > { %1045 = sbr.rel (%p1446_p0) target bundleno = 1092 (0x444), region = 68  ;;  %1132 = vmatprep.mubr.bf16.mxu0 (!%p1446_p0), %v1891_v55  ;;  %1205 = vmatprep.mubr.bf16.mxu1 (!%p1446_p0), %v1891_v55  ;;  %v1697_v56 = vld [vmem:[#allocation8 + $0x14] ss:$8 sps:$4 sm:$0xff] (!%p1446_p0)   ;;  %v1699_v57 = vld [vmem:[#allocation8 + $0x10] ss:$8 sps:$4 sm:$0xff] (!%p1446_p0)   ;;  %v1145_v0 = vld [vmem:[%s2270_s5] sm:$0xff] (!%p1446_p0) }
 0x27f   : > { %1100 = vmatprep.subr.bf16.mxu0 (!%p1446_p0), %v1694_v53  ;;  %1693 = vset.pattern.permute.xlu0 (!%p1446_p0), %v1891_v55  ;;  %v1700_v58 = vld [vmem:[#allocation8 + $0x24] ss:$8 sps:$4 sm:$0xff] (!%p1446_p0)   ;;  %v1702_v59 = vld [vmem:[#allocation8 + $0x20] ss:$8 sps:$4 sm:$0xff] (!%p1446_p0)   ;;  %v1703_v60 = vld [vmem:[#allocation8 + $0x34] ss:$8 sps:$4 sm:$0xff] (!%p1446_p0)  }
 0x280   : > { %1101 = vmatpush1.bf16.msra.mxu0 (!%p1446_p0), %v1696_v54  ;;  %v1705_v61 = vld [vmem:[#allocation8 + $0x30] ss:$8 sps:$4 sm:$0xff] (!%p1446_p0)   ;;  %1149 = vperm.xlu0 (!%p1446_p0), %1693, %v1145_v0   ;;  %vm1166_vm7 = vcmask (!%p1446_p0), 1043456   ;;  %v1706_v9 = vld [vmem:[%s2269_s4] sm:$0xff] (!%p1446_p0)   ;;  %vm1162_vm8 = vcmask (!%p1446_p0), 64512  }
 0x281   : > { %1102 = vmatprep.subr.bf16.mxu0 (!%p1446_p0), %v1697_v56  ;;  %v1146_v1 = vld [vmem:[%s2270_s5 + $0x8] sm:$0xff] (!%p1446_p0) }
 0x282   : > { %v1046_v62 = vld [vmem:[#allocation2] sm:$0xff] (!%p1446_p0) }
 0x283   : > { %v1047_v63 = vpack.c.bf16 (!%p1446_p0), %v1046_v62, %v1046_v62 }
 0x284   : > { %1103 = vmatpush1.bf16.msra.mxu0 (!%p1446_p0), %v1699_v57  ;;  %1154 = vperm.xlu0 (!%p1446_p0), %1693, %v1146_v1  }
 0x285   : > { %1104 = vmatprep.subr.bf16.mxu0 %v1700_v58 }
 0x288   : > { %1105 = vmatpush1.bf16.msra.mxu0 %v1702_v59 }
 0x289   : > { %1106 = vmatprep.subr.bf16.mxu0 %v1703_v60 }
 0x28c   : > { %1107 = vmatpush1.bf16.msra.mxu0 %v1705_v61 }
 0x28f   : > { %1455 = vmatmul.mubr.msk.bf16.vlgmr.msra.gmra.mrb[0].mxu0 %vm1096_vm6, %v1047_v63 }
 0x2ff   : > { %v1150_v10 = vpop.permute.xlu0 %1149 }
 0x303   : > { %v1155_v14 = vpop.permute.xlu0 %1154 }
 0x362   : > { %v1134_v2 = vpop.f32.mrb[0].mxu0 }
 0x363   : > { %v1143_v3 = vpack.c.bf16 %v1134_v2, %v1134_v2  ;;  %v1136_v4 = vpop.f32.mrb[1].mxu0 }
 0x364   : > { %v1144_v5 = vpack.c.bf16 %v1136_v4, %v1136_v4  ;;  %v1138_v6 = vpop.f32.mrb[2].mxu0 }
 0x365   : > { %v1139_v7 = vpop.f32.mrb[3].mxu0  ;;  %v1168_v8 = vsel %vm1166_vm7, %v1143_v3, 0 }
 0x366   : > { %1457 = vmatprep.subr.msk.bf16.mxu1 %vm1166_vm7, %v1144_v5 }
 0x367   : > { %1174 = vmatpush1.bf16.msra.mxu1 %v1168_v8 }
 0x36a   : > { %1458 = vmatmul.mubr.msk.bf16.vlgmr.msra.gmra.mrb[0].mxu1 %vm1162_vm8, %v1706_v9 }
 0x43d   : > { %v1207_v11 = vpop.f32.mrb[0].mxu1 }
 0x43e   : > { %v1208_v12 = vadd.f32 %v1207_v11, %v1150_v10  ;;  %v1209_v13 = vpop.f32.mrb[1].mxu1 }
 0x43f   : > { %v1210_v15 = vadd.f32 %v1209_v13, %v1150_v10  ;;  %v1211_v16 = vpop.f32.mrb[2].mxu1 }
 0x440   : > { %1216 = vst [vmem:[#allocation9] sm:$0xff] %v1208_v12  ;;  %v1212_v17 = vadd.f32 %v1211_v16, %v1155_v14  ;;  %v1213_v18 = vpop.f32.mrb[3].mxu1 }
 0x441   : > { %1217 = vst [vmem:[#allocation9 + $0x8] sm:$0xff] %v1210_v15  ;;  %v1214_v19 = vadd.f32 %v1213_v18, %v1155_v14 }
 0x442   : > { %1218 = vst [vmem:[#allocation9 + $0x10] sm:$0xff] %v1212_v17 }
 0x443   : > { %1219 = vst [vmem:[#allocation9 + $0x18] sm:$0xff] %v1214_v19 }
 0x444 PF: > { %p1516_p11 = scmp.eq.s32.totalorder %s1959_s27, 7  ;;  %s1892_s19 = smov [#allocation9]  }
 0x445   : > { %s1230_s16 = sshll.u32 %s1892_s19, 4  ;;  %s1231_s16 = int_to_ptr.vmem [resolvable:$true] %s1230_s16 }
 0x446   : > { %s1793_s18 = scalar_lea.vmem %s1231_s16, 512  ;;  %p1800_p2 = scmp.lt.s32.totalorder %s1231_s16, %s1231_s16 }
 0x447   : > { %p1794_p3 = scmp.ne.s32.totalorder %s1231_s16, %s1793_s18  ;;  %p1801_p8 = scmp.lt.s32.totalorder %s1793_s18, %s1793_s18 }
 0x449   : > { %p1795_p12 = pnand %p1794_p3, %p1516_p11  ;;  %p1802_p13 = por %p1801_p8, %p1800_p2 }
 0x44b   : > { %p1796_p1 = pneg %p1795_p12 }
 0x44d   : > { %p1803_p4 = pnand %p1802_p13, %p1796_p1 }
 0x44f   : > { %1806 = shalt.err (!%p1803_p4)
}
 0x450   : > { %s1807_s13 = scalar_lea.hbm %s2271_s6, 512 }
 0x451   : > { %p1808_p5 = scmp.ne.s32.totalorder %s2271_s6, %s1807_s13  ;;  %p1813_p9 = scmp.lt.u32.totalorder %s1807_s13, %s2271_s6 }
 0x453   : > { %p1809_p6 = pnand %p1808_p5, %p1516_p11 }
 0x455   : > { %p1810_p7 = pneg %p1809_p6 }
 0x457   : > { %p1815_p10 = pnand %p1813_p9, %p1810_p7 }
 0x459   : > { %1818 = shalt.err (!%p1815_p10)
}
 0x45a   : > { %s1893_s12 = smov 256   ;;  %s1894_s24 = smov 16  }
 0x45b   : > { %1497 = dma.vmem_to_hbm [thread:$0]  (%p1516_p11), %s1231_s16, 512, %s2271_s6, [#allocation5], %s1893_s12, %s1893_s12, %s1894_s24  }
 0x45c   : > { %1856 = dma.done.wait (%p1516_p11), [#allocation5], 512  }
 0x45d   : > { %1858 = vsyncadd (%p1516_p11), [#allocation5], 4294966784 }
 0x45e PF: > { %s21_s26 = sadd.s32 1, %s1881_s26   ;;  %s2288_s10 = smov %s2295_s21 }
 0x45f   : > { %p18_p0 = scmp.ge.s32.totalorder %s21_s26, 10   ;;  %s2289_s21 = smov %s1865_s22 }
 0x460   : > { %s2290_s22 = smov %s1869_s23  ;;  %s2291_s23 = smov %s2052_s8 }
 0x461   : > { %s2292_s24 = smov %s1877_s25  ;;  %s2293_s25 = smov %s2288_s10 }
 0x462   :  { %20 = sbr.rel (!%p18_p0) target bundleno = 6 (0x6), region = 110 }
 0x469   :  { %1246 = vsyncpa [#allocation4], 1 }
 0x46a   :  { %1248 = vsyncpa [#allocation4 + $0x1], 1 }
 0x46b   :  { %1249 = vsyncpa [#allocation7], 1 }
 0x46c   :  { %1251 = vsyncpa [#allocation7 + $0x1], 1 }
 0x46d   :  { %1252 = vsyncpa [#allocation5], 1 }
 0x46e   :  { %1254 = vsyncpa [#allocation5 + $0x1], 1 }

</bundles_post_ra>
